<compile_context>
chip_gen: v5e
topology: v5e:2x2
jax: 0.10.0
libtpu: 0.0.40
codegen_flags: <defaults>
</compile_context>

<pallas_src>
import jax
import jax.numpy as jnp
import numpy as np
from jax.experimental import pallas as pl
from jax.experimental.pallas import tpu as pltpu


def _attention_blstm_kernel(x_ref, u_ref, out_ref, alphas_ref):
    # Per grid step (one batch tile of BB examples):
    #   x_ref:      (BB, T, H)  inputs tile
    #   u_ref:      (1, H)      attention projection vector (row layout, H on lanes)
    #   out_ref:    (BB, H)     pooled output tile
    #   alphas_ref: (BB, T)     attention weights tile (T on lanes)
    x = x_ref[...].astype(jnp.float32)                 # (BB, T, H)
    u = u_ref[...].astype(jnp.float32)                 # (1, H)

    # v = tanh(inputs); vu = v @ u_omega  -- VPU multiply + lane (H) reduction
    # rather than an N=1 MXU matvec.  Keep T on sublanes ((BB, T, 1)) so the
    # softmax and the broadcast against x need no relayout.
    v = jnp.tanh(x)                                    # (BB, T, H)
    vu = jnp.sum(v * u[None, :, :], axis=-1,
                 keepdims=True)                        # (BB, T, 1), T on sublanes

    # softmax over the sequence axis (torch dim=1), numerically stable.
    m = jnp.max(vu, axis=1, keepdims=True)             # (BB, 1, 1)
    e = jnp.exp(vu - m)                                # (BB, T, 1)
    denom = jnp.sum(e, axis=1, keepdims=True)          # (BB, 1, 1)
    inv = pl.reciprocal(denom)                         # exact (approx=False default)

    # output = tanh(alphas @ inputs) == tanh(sum_t alpha_t * x_t).
    # Use unnormalized weights for the T reduction (lane splat of (BB,T,1) over H)
    # and fold 1/denom into the (BB, H) result once.
    pooled = jnp.sum(e * x, axis=1)                    # (BB, H)
    out = jnp.tanh(pooled * inv[:, 0, :])              # (BB, H)

    # Single relayout: produce the lane-dense (BB, T) alphas only at the store.
    alphas = jnp.squeeze(e * inv, axis=-1)             # (BB, T), T on lanes

    out_ref[...] = out.astype(out_ref.dtype)
    alphas_ref[...] = alphas.astype(alphas_ref.dtype)


def _vmem_capacity_bytes():
    """Physical VMEM per TensorCore; conservative fallback = v7x's 64 MiB."""
    try:
        info = pltpu.get_tpu_info()
        cap = getattr(info, "vmem_capacity_bytes", None)
        if cap:
            return int(cap)
    except Exception:
        pass
    return 64 << 20


def _vmem_budgets():
    """Return (block_budget_bytes, vmem_limit_bytes), both derived from the same
    physical-VMEM number so tile choice and compiler limit stay consistent."""
    cap = _vmem_capacity_bytes()
    # Live blocks + materialized temporaries kept to ~1/3 of physical VMEM
    # (~21 MiB on v7x's 64 MiB; 40 MiB on v5e/v6e's 128 MiB).
    block_budget = max(8 << 20, min(cap // 3, 40 << 20))
    # Scoped limit: room for double-buffering + temporaries, with headroom.
    vmem_limit = max(32 << 20, min(cap - (8 << 20), 2 * block_budget))
    vmem_limit = min(vmem_limit, cap)
    return block_budget, vmem_limit


def _pick_batch_tile(B, T, H, x_itemsize, block_budget_bytes):
    """Pick a batch tile BB whose double-buffered blocks PLUS the in-kernel f32
    temporaries (tanh(x), e*x) stay within block_budget_bytes."""
    per_example = (
        2 * T * H * x_itemsize      # double-buffered x input block
        + 2 * T * H * 4             # ~2 materialized f32 temporaries
        + 2 * (T + H) * 4           # double-buffered f32 output blocks
    )
    bb = max(1, block_budget_bytes // max(per_example, 1))
    if bb >= B:
        return B  # one tile covers the whole batch (blocks equal full dims)
    # Keep partial tiles sublane-aligned so (BB, T)/(BB, H) blocks satisfy the
    # (8, 128) layout constraint.
    bb = max(8, (bb // 8) * 8)
    return int(min(bb, B))


def attention_blstm_forward(inputs, u_omega, *, batch_tile=None):
    """inputs: (B, T, H) float32 or bfloat16, u_omega: (H, 1)
    -> (output (B, H) f32, alphas (B, T) f32), matching the PyTorch forward."""
    B, T, H = inputs.shape
    x_itemsize = jnp.dtype(inputs.dtype).itemsize
    block_budget, vmem_limit = _vmem_budgets()

    if batch_tile is None:
        BB = _pick_batch_tile(B, T, H, x_itemsize, block_budget)
        # v7x has 2 TensorCores/chip: guarantee >= 2 grid steps so the
        # "parallel" batch axis shards across both cores.  Only when B is large
        # enough to keep sublane-aligned (>= 8) tiles; on single-TC v5e/v6e the
        # extra grid step costs ~0.35 us, negligible at these sizes.
        if BB >= B and B >= 16:
            BB = min(BB, max(8, ((B // 2) // 8) * 8))
    else:
        BB = int(batch_tile)
    nb = pl.cdiv(B, BB)

    # Present u_omega as a lane-dense (1, H) row for the in-kernel broadcast.
    u_row = u_omega.reshape(1, H)

    cost = pl.CostEstimate(
        flops=4 * B * T * H,                              # vu + weighted sum
        transcendentals=B * T * H + B * T + B * H,        # tanh(x), exp, tanh(out)
        bytes_accessed=B * T * H * x_itemsize + H * x_itemsize + B * (T + H) * 4,
    )

    output, alphas = pl.pallas_call(
        _attention_blstm_kernel,
        out_shape=(
            jax.ShapeDtypeStruct((B, H), jnp.float32),
            jax.ShapeDtypeStruct((B, T), jnp.float32),
        ),
        grid_spec=pltpu.PrefetchScalarGridSpec(
            num_scalar_prefetch=0,
            grid=(nb,),
            in_specs=[
                pl.BlockSpec((BB, T, H), lambda b: (b, 0, 0)),
                pl.BlockSpec((1, H), lambda b: (0, 0)),
            ],
            out_specs=[
                pl.BlockSpec((BB, H), lambda b: (b, 0)),
                pl.BlockSpec((BB, T), lambda b: (b, 0)),
            ],
        ),
        compiler_params=pltpu.CompilerParams(
            dimension_semantics=("parallel",),   # batch tiles shard across TCs (v7x)
            vmem_limit_bytes=int(vmem_limit),
        ),
        cost_estimate=cost,
    )(inputs, u_row)
    return output, alphas


def _reference(inputs, u_omega):
    # Pure-JAX reference mirroring the PyTorch forward exactly (in f32).
    x = inputs.astype(jnp.float32)
    u = u_omega.astype(jnp.float32)
    v = jnp.tanh(x)
    vu = jnp.squeeze(jnp.matmul(v, u), -1)             # (B, T)
    alphas = jax.nn.softmax(vu, axis=1)                # (B, T)
    output = jnp.einsum("bt,bth->bh", alphas, x)       # (B, H)
    output = jnp.tanh(output)
    return output, alphas


if __name__ == "__main__":
    key = jax.random.PRNGKey(0)
    k_in, k_u, k_in2, k_u2 = jax.random.split(key, 4)

    # --- small test shape consistent with the module: B=2, T=8, H=32 ---
    B, T, H = 2, 8, 32
    inputs = jax.random.normal(k_in, (B, T, H), dtype=jnp.float32)
    # Deterministic xavier_normal_ init for u_omega of shape (hidden_size, 1):
    # std = sqrt(2 / (fan_in + fan_out)) = sqrt(2 / (H + 1))
    xavier_std = float(np.sqrt(2.0 / (H + 1)))
    u_omega = xavier_std * jax.random.normal(k_u, (H, 1), dtype=jnp.float32)

    output, alphas = attention_blstm_forward(inputs, u_omega)
    output = jax.block_until_ready(output)
    alphas = jax.block_until_ready(alphas)

    ref_out, ref_alphas = _reference(inputs, u_omega)
    np.testing.assert_allclose(np.asarray(output), np.asarray(ref_out),
                               rtol=1e-5, atol=1e-5)
    np.testing.assert_allclose(np.asarray(alphas), np.asarray(ref_alphas),
                               rtol=1e-5, atol=1e-5)

    # --- second (still small) shape exercising the multi-tile / megacore path:
    # B=24 >= 16 forces BB=8 -> 3 grid steps, H=128 is lane-dense.
    B2, T2, H2 = 24, 8, 128
    inputs2 = jax.random.normal(k_in2, (B2, T2, H2), dtype=jnp.float32)
    xavier_std2 = float(np.sqrt(2.0 / (H2 + 1)))
    u_omega2 = xavier_std2 * jax.random.normal(k_u2, (H2, 1), dtype=jnp.float32)

    output2, alphas2 = attention_blstm_forward(inputs2, u_omega2)
    output2 = jax.block_until_ready(output2)
    alphas2 = jax.block_until_ready(alphas2)

    ref_out2, ref_alphas2 = _reference(inputs2, u_omega2)
    np.testing.assert_allclose(np.asarray(output2), np.asarray(ref_out2),
                               rtol=1e-5, atol=1e-5)
    np.testing.assert_allclose(np.asarray(alphas2), np.asarray(ref_alphas2),
                               rtol=1e-5, atol=1e-5)

    print("KERNEL_OK")
</pallas_src>

<mosaic_0001>
module attributes {stable_mosaic.version = 11 : i64} {
  func.func @_attention_blstm_kernel(%arg0: i32, %arg1: memref<2x8x32xf32, #tpu.memory_space<vmem>>, %arg2: memref<1x32xf32, #tpu.memory_space<vmem>>, %arg3: memref<2x32xf32, #tpu.memory_space<vmem>>, %arg4: memref<2x8xf32, #tpu.memory_space<vmem>>) attributes {dimension_semantics = [#tpu.dimension_semantics<parallel>], iteration_bounds = array<i64: 1>, scalar_prefetch = 0 : i64, scratch_operands = 0 : i64, tpu.core_type = #tpu.core_type<tc>, window_params = [{transform_indices = @transform_0, window_bounds = array<i64: 2, 8, 32>}, {pipeline_mode = #tpu.pipeline_mode<synchronous>, transform_indices = @transform_1, window_bounds = array<i64: 1, 32>}, {transform_indices = @transform_2, window_bounds = array<i64: 2, 32>}, {transform_indices = @transform_3, window_bounds = array<i64: 2, 8>}]} {
    %c0 = arith.constant 0 : index
    %c0_0 = arith.constant 0 : index
    %c0_1 = arith.constant 0 : index
    %0 = vector.load %arg1[%c0, %c0_0, %c0_1] : memref<2x8x32xf32, #tpu.memory_space<vmem>>, vector<2x8x32xf32>
    %c0_2 = arith.constant 0 : index
    %c0_3 = arith.constant 0 : index
    %1 = vector.load %arg2[%c0_2, %c0_3] : memref<1x32xf32, #tpu.memory_space<vmem>>, vector<1x32xf32>
    %2 = math.tanh %0 : vector<2x8x32xf32>
    %3 = vector.shape_cast %1 : vector<1x32xf32> to vector<1x1x32xf32>
    %4 = vector.broadcast %3 : vector<1x1x32xf32> to vector<2x8x32xf32>
    %5 = arith.mulf %2, %4 : vector<2x8x32xf32>
    %cst = arith.constant dense<0.000000e+00> : vector<2x8xf32>
    %6 = vector.multi_reduction <add>, %5, %cst [2] : vector<2x8x32xf32> to vector<2x8xf32>
    %7 = vector.shape_cast %6 : vector<2x8xf32> to vector<2x8x1xf32>
    %cst_4 = arith.constant dense<0xFF800000> : vector<2x1xf32>
    %8 = vector.multi_reduction <maximumf>, %7, %cst_4 [1] : vector<2x8x1xf32> to vector<2x1xf32>
    %9 = vector.shape_cast %8 : vector<2x1xf32> to vector<2x1x1xf32>
    %10 = vector.broadcast %9 : vector<2x1x1xf32> to vector<2x8x1xf32>
    %11 = arith.subf %7, %10 : vector<2x8x1xf32>
    %12 = math.exp %11 : vector<2x8x1xf32>
    %cst_5 = arith.constant dense<0.000000e+00> : vector<2x1xf32>
    %13 = vector.multi_reduction <add>, %12, %cst_5 [1] : vector<2x8x1xf32> to vector<2x1xf32>
    %14 = vector.shape_cast %13 : vector<2x1xf32> to vector<2x1x1xf32>
    %15 = tpu.reciprocal %14 : vector<2x1x1xf32> -> vector<2x1x1xf32>
    %16 = vector.broadcast %12 : vector<2x8x1xf32> to vector<2x8x32xf32>
    %17 = arith.mulf %16, %0 : vector<2x8x32xf32>
    %cst_6 = arith.constant dense<0.000000e+00> : vector<2x32xf32>
    %18 = vector.multi_reduction <add>, %17, %cst_6 [1] : vector<2x8x32xf32> to vector<2x32xf32>
    %19 = vector.shape_cast %15 : vector<2x1x1xf32> to vector<2x1xf32>
    %20 = vector.broadcast %19 : vector<2x1xf32> to vector<2x32xf32>
    %21 = arith.mulf %18, %20 : vector<2x32xf32>
    %22 = math.tanh %21 : vector<2x32xf32>
    %23 = vector.broadcast %15 : vector<2x1x1xf32> to vector<2x8x1xf32>
    %24 = arith.mulf %12, %23 : vector<2x8x1xf32>
    %25 = vector.shape_cast %24 : vector<2x8x1xf32> to vector<2x8xf32>
    %c0_7 = arith.constant 0 : index
    %c0_8 = arith.constant 0 : index
    %26 = vector.load %arg3[%c0_7, %c0_8] : memref<2x32xf32, #tpu.memory_space<vmem>>, vector<2x32xf32>
    tpu.vector_store %arg3[%c0_7, %c0_8], %22 {strides = array<i32>} : memref<2x32xf32, #tpu.memory_space<vmem>>, vector<2x32xf32>,
    %c0_9 = arith.constant 0 : index
    %c0_10 = arith.constant 0 : index
    %27 = vector.load %arg4[%c0_9, %c0_10] : memref<2x8xf32, #tpu.memory_space<vmem>>, vector<2x8xf32>
    tpu.vector_store %arg4[%c0_9, %c0_10], %25 {strides = array<i32>} : memref<2x8xf32, #tpu.memory_space<vmem>>, vector<2x8xf32>,
    return
  }
  func.func @transform_0(%arg0: i32) -> (i32, i32, i32) {
    %c0_i32 = arith.constant 0 : i32
    %c0_i32_0 = arith.constant 0 : i32
    %c0_i32_1 = arith.constant 0 : i32
    return %arg0, %c0_i32, %c0_i32_0 : i32, i32, i32
  }
  func.func @transform_1(%arg0: i32) -> (i32, i32) {
    %c0_i32 = arith.constant 0 : i32
    %c0_i32_0 = arith.constant 0 : i32
    %c0_i32_1 = arith.constant 0 : i32
    return %c0_i32, %c0_i32_0 : i32, i32
  }
  func.func @transform_2(%arg0: i32) -> (i32, i32) {
    %c0_i32 = arith.constant 0 : i32
    %c0_i32_0 = arith.constant 0 : i32
    return %arg0, %c0_i32 : i32, i32
  }
  func.func @transform_3(%arg0: i32) -> (i32, i32) {
    %c0_i32 = arith.constant 0 : i32
    %c0_i32_0 = arith.constant 0 : i32
    return %arg0, %c0_i32 : i32, i32
  }
}

</mosaic_0001>

<bundles_post_ra>
// kernel: tpu_custom_call.1
= control target key start
LH: loop header
LB: loop body
LE: loop exit
PB: predicated region body
PF: predicated region fallthrough
CT: control target
= control target key end

     0   :  { %9 = vsyncpa [#allocation3], 0  ;;  %s370_s0 = inlined_call_operand.hbm [shape: f32[2,8,32], index: 0, kind: input, shape index: {}]   ;;  %s371_s1 = inlined_call_operand.hbm [shape: f32[1,32], index: 1, kind: input, shape index: {}]   ;;  %s372_s2 = inlined_call_operand.hbm [shape: f32[2,32], index: 2, kind: output, shape index: {0}]   ;;  %s373_s3 = inlined_call_operand.hbm [shape: f32[2,8], index: 3, kind: output, shape index: {1}]  }
   0x1   :  { %10 = vsyncpa [#allocation6], 0 }
   0x2   :  { %11 = vsyncpa [#allocation4], 0 }
   0x3   :  { %12 = vsyncpa [#allocation9], 0  ;;  %s17_s14 = sshll.u32 %s370_s0, 4  ;;  %s320_s15 = smov [#allocation2]   ;;  %s18_s14 = int_to_ptr.hbm [resolvable:$true] %s17_s14 }
   0x4   :  { %s19_s16 = sshll.u32 %s320_s15, 4  ;;  %s31_s19 = sshll.u32 %s371_s1, 4  ;;  %s20_s16 = int_to_ptr.vmem [resolvable:$true] %s19_s16  ;;  %s32_s19 = int_to_ptr.hbm [resolvable:$true] %s31_s19 }
   0x5   :  { %s321_s20 = smov 128   ;;  %s322_s21 = smov 8  }
   0x6   :  { %25 = dma.hbm_to_vmem [thread:$0]  %s18_s14, 256, %s20_s16, [#allocation3], %s321_s20, %s321_s20, %s322_s21  }
   0x7   :  { %s323_s22 = smov [#allocation5]  }
   0x8   :  { %s33_s23 = sshll.u32 %s323_s22, 4  ;;  %s34_s23 = int_to_ptr.vmem [resolvable:$true] %s33_s23 }
   0x9   :  { %36 = dma.hbm_to_vmem [thread:$0]  %s32_s19, 16, %s34_s23, [#allocation6]  }
   0xa   :  { %312 = dma.done.wait [#allocation3], 256  }
   0xb   :  { %313 = vsyncadd [#allocation3], 4294967040 }
   0xc   :  { %314 = dma.done.wait [#allocation6], 16  }
   0xd   :  { %315 = vsyncadd [#allocation6], 4294967280  ;;  %v45_v0 = vld [vmem:[#allocation2] sm:$0xff]  ;;  %v46_v1 = vld [vmem:[#allocation2 + $0x8] sm:$0xff]  ;;  %vm55_vm0 = vcmask 261120   ;;  %s324_s0 = smov [#allocation8]  }
   0xe   :  { %200 = vtanh.f32 %v45_v0  ;;  %v199_v2 = vld [vmem:[#allocation5] ss:$0 sm:$0xff]  ;;  %s175_s1 = sshll.u32 %s324_s0, 4  ;;  %s177_s26 = sshll.u32 %s373_s3, 4  ;;  %vm144_vm9 = vcmask 1041409   ;;  %vm157_vm10 = vcmask 58368   ;;  %s176_s1 = int_to_ptr.vmem [resolvable:$true] %s175_s1  ;;  %s178_s26 = int_to_ptr.hbm [resolvable:$true] %s177_s26 }
   0xf   :  { %202 = vtanh.f32 %v46_v1  ;;  %s325_s27 = smov [#allocation7]   ;;  %s166_s4 = sshll.u32 %s372_s2, 4  ;;  %vm147_vm11 = vcmask 254976   ;;  %s167_s4 = int_to_ptr.hbm [resolvable:$true] %s166_s4 }
  0x10   :  { %s164_s28 = sshll.u32 %s325_s27, 4  ;;  %s165_s28 = int_to_ptr.vmem [resolvable:$true] %s164_s28 }
  0x14   :  { %v201_v3 = vpop.eup %200 }
  0x15   :  { %v53_v4 = vmul.f32 %v201_v3, %v199_v2  ;;  %v203_v5 = vpop.eup %202 }
  0x16   :  { %v54_v7 = vmul.f32 %v203_v5, %v199_v2 }
  0x17   :  { %v56_v6 = vsel %vm55_vm0, %v53_v4, 0.0  ;;  %v151_v4 = vlaneseq }
  0x18   :  { %57 = vadd.xlane.f32.xlu0 %v56_v6  ;;  %v59_v8 = vsel %vm55_vm0, %v54_v7, 0.0 }
  0x20   :  { %60 = vadd.xlane.f32.xlu0 %v59_v8 }
  0x8b   :  { %v58_v9 = vpop.xlane.xlu0 %57 }
  0x8c   :  { %v62_v10 = vrot.slane %v58_v9, 4 }
  0x8e   :  { %v63_v11 = vmax.f32 %v58_v9, %v62_v10 }
  0x90   :  { %v64_v12 = vrot.slane %v63_v11, 2 }
  0x92   :  { %v65_v13 = vmax.f32 %v63_v11, %v64_v12  ;;  %v152_v12 = vand.u32 127, %v151_v4 }
  0x93   :  { %v61_v14 = vpop.xlane.xlu0 %60 }
  0x94   :  { %v66_v15 = vrot.slane %v65_v13, 1  ;;  %v68_v16 = vrot.slane %v61_v14, 4 }
  0x96   :  { %v67_v17 = vmax.f32 %v65_v13, %v66_v15  ;;  %v69_v18 = vmax.f32 %v61_v14, %v68_v16 }
  0x98   :  { %v74_v19 = vsub.f32 %v58_v9, %v67_v17  ;;  %v70_v20 = vrot.slane %v69_v18, 2 }
  0x9a   :  { %v76_v21 = vmul.f32 1.442695, %v74_v19  ;;  %v71_v22 = vmax.f32 %v69_v18, %v70_v20 }
  0x9c   :  { %204 = vpow2.f32 %v76_v21  ;;  %v72_v23 = vrot.slane %v71_v22, 1 }
  0x9e   :  { %v73_v24 = vmax.f32 %v71_v22, %v72_v23 }
  0xa0   :  { %v75_v25 = vsub.f32 %v61_v14, %v73_v24 }
  0xa2   :  { %v354_v26 = vpop.eup %204  ;;  %v78_v27 = vmul.f32 1.442695, %v75_v25 }
  0xa3   :  { %v80_v28 = vrot.slane %v354_v26, 4  ;;  %v120_v31 = vmul.f32 %v354_v26, %v45_v0 }
  0xa4   :  { %206 = vpow2.f32 %v78_v27 }
  0xa5   :  { %v81_v29 = vadd.f32 %v354_v26, %v80_v28  ;;  %v122_v37 = vsel %vm55_vm0, %v120_v31, 0.0 }
  0xa6   :  { %v123_v42 = vrot.slane %v122_v37, 4 }
  0xa7   :  { %v82_v30 = vrot.slane %v81_v29, 2 }
  0xa8   :  { %v124_v46 = vadd.f32 %v123_v42, %v122_v37 }
  0xa9   :  { %v83_v32 = vadd.f32 %v82_v30, %v81_v29 }
  0xaa   :  { %v207_v33 = vpop.eup %206  ;;  %v125_v51 = vrot.slane %v124_v46, 2 }
  0xab   :  { %v84_v34 = vrot.slane %v83_v32, 1  ;;  %v86_v35 = vrot.slane %v207_v33, 4  ;;  %v121_v36 = vmul.f32 %v207_v33, %v46_v1 }
  0xac   :  { %v126_v55 = vadd.f32 %v125_v51, %v124_v46 }
  0xad   :  { %v85_v38 = vadd.f32 %v84_v34, %v83_v32  ;;  %v87_v39 = vadd.f32 %v207_v33, %v86_v35  ;;  %v129_v40 = vsel %vm55_vm0, %v121_v36, 0.0 }
  0xae   :  { %v130_v44 = vrot.slane %v129_v40, 4  ;;  %v127_v63 = vrot.slane %v126_v55, 1 }
  0xaf   :  { %208 = vrcp.f32 %v85_v38  ;;  %v88_v41 = vrot.slane %v87_v39, 2  ;;  %v103_v57 = vand.u32 2147483648, %v85_v38  ;;  %vm97_vm2 = vweird.f32 %v85_v38 }
  0xb0   :  { %v131_v49 = vadd.f32 %v130_v44, %v129_v40  ;;  %v101_v59 = vand.u32 2147483647, %v85_v38  ;;  %v128_v8 = vadd.f32 %v127_v63, %v126_v55 }
  0xb1   :  { %v89_v43 = vadd.f32 %v88_v41, %v87_v39  ;;  %v104_v0 = vor.u32 1.1754944e-38, %v103_v57 }
  0xb2   :  { %v132_v53 = vrot.slane %v131_v49, 2  ;;  %vm102_vm4 = vcmp.eq.f32.partialorder %v101_v59, 8.507059e+37 }
  0xb3   :  { %v90_v45 = vrot.slane %v89_v43, 1 }
  0xb4   :  { %v133_v60 = vadd.f32 %v132_v53, %v131_v49 }
  0xb5   :  { %v209_v47 = vpop.eup %208  ;;  %v91_v48 = vadd.f32 %v90_v45, %v89_v43 }
  0xb6   :  { %v93_v50 = vmul.f32 %v209_v47, %v85_v38  ;;  %vm98_vm1 = vweird.f32 %v209_v47  ;;  %v134_v3 = vrot.slane %v133_v60, 1 }
  0xb7   :  { %210 = vrcp.f32 %v91_v48  ;;  %vm99_vm3 = vmor %vm97_vm2, %vm98_vm1  ;;  %v117_v2 = vand.u32 2147483648, %v91_v48  ;;  %v115_v7 = vand.u32 2147483647, %v91_v48  ;;  %vm111_vm6 = vweird.f32 %v91_v48 }
  0xb8   :  { %v94_v52 = vsub.f32 1.0, %v93_v50  ;;  %v135_v14 = vadd.f32 %v134_v3, %v133_v60 }
  0xb9   :  { %v118_v10 = vor.u32 1.1754944e-38, %v117_v2  ;;  %vm116_vm8 = vcmp.eq.f32.partialorder %v115_v7, 8.507059e+37 }
  0xba   :  { %v95_v54 = vmul.f32 %v209_v47, %v94_v52 }
  0xbc   :  { %v96_v56 = vadd.f32 %v209_v47, %v95_v54 }
  0xbd   :  { %v211_v58 = vpop.eup %210 }
  0xbe   :  { %v107_v61 = vmul.f32 %v211_v58, %v91_v48  ;;  %v100_v62 = vsel %vm99_vm3, %v209_v47, %v96_v56  ;;  %vm112_vm5 = vweird.f32 %v211_v58 }
  0xbf   :  { %v105_v5 = vsel %vm102_vm4, %v104_v0, %v100_v62  ;;  %vm113_vm7 = vmor %vm111_vm6, %vm112_vm5 }
  0xc0   :  { %v108_v1 = vsub.f32 1.0, %v107_v61  ;;  %v136_v11 = vmul.f32 %v128_v8, %v105_v5  ;;  %v140_v15 = vmul.f32 %v354_v26, %v105_v5 }
  0xc2   :  { %v109_v6 = vmul.f32 %v211_v58, %v108_v1  ;;  %212 = vtanh.f32 %v136_v11  ;;  %v153_v19 = vperm.slane %v140_v15, %v152_v12 }
  0xc4   :  { %v110_v9 = vadd.f32 %v211_v58, %v109_v6 }
  0xc6   :  { %v114_v13 = vsel %vm113_vm7, %v211_v58, %v110_v9 }
  0xc7   :  { %v119_v16 = vsel %vm116_vm8, %v118_v10, %v114_v13 }
  0xc8   :  { %v137_v17 = vmul.f32 %v135_v14, %v119_v16  ;;  %v141_v18 = vmul.f32 %v207_v33, %v119_v16  ;;  %v213_v22 = vpop.eup %212 }
  0xca   :  { %214 = vtanh.f32 %v137_v17  ;;  %v154_v20 = vperm.slane %v141_v18, %v152_v12 }
  0xcc   :  { %v155_v21 = vsel %vm144_vm9, %v154_v20, %v153_v19 }
  0xcd   :  { %158 = vst.msk [vmem:[#allocation8] sm:$0x3] %vm157_vm10, %v155_v21 }
  0xce   :  { %180 = dma.vmem_to_hbm [thread:$0]  %s176_s1, 32, %s178_s26, [#allocation9]  }
  0xd0   :  { %v215_v23 = vpop.eup %214 }
  0xd1   :  { %v145_v24 = vsel %vm144_vm9, %v215_v23, %v213_v22 }
  0xd2   :  { %148 = vst.msk [vmem:[#allocation7] sm:$0x3] %vm147_vm11, %v145_v24 }
  0xd3   :  { %169 = dma.vmem_to_hbm [thread:$0]  %s165_s28, 32, %s167_s4, [#allocation4]  }
  0xd4   :  { %316 = dma.done.wait [#allocation4], 32  }
  0xd5   :  { %317 = vsyncadd [#allocation4], 4294967264 }
  0xd6   :  { %318 = dma.done.wait [#allocation9], 32  }
  0xd7   :  { %319 = vsyncadd [#allocation9], 4294967264 }
  0xd8   :  { %189 = vsyncpa [#allocation3], 1 }
  0xd9   :  { %190 = vsyncpa [#allocation6], 1 }
  0xda   :  { %191 = vsyncpa [#allocation4], 1 }
  0xdb   :  { %192 = vsyncpa [#allocation9], 1 }

</bundles_post_ra>
